<compile_context>
chip_gen: v6e
topology: v6e:2x2x1
jax: 0.10.0
libtpu: 0.0.40
codegen_flags: <defaults>
</compile_context>

<pallas_src>
import functools

import jax
import jax.numpy as jnp
from jax.experimental import pallas as pl
from jax.experimental.pallas import tpu as pltpu


def _cdiv(a: int, b: int) -> int:
    return -(-a // b)


def _preemphasis_kernel(x_ref, halo_ref, o_ref, *, coef: float):
    """One (Bt, Tt) tile of y = x - coef * shift_right(x)."""
    t = pl.program_id(1)  # T-tile index

    x = x_ref[...].astype(jnp.float32)            # (Bt, Tt)
    # prev[:, j] = x[:, j-1] for j >= 1 (column 0 is wrong, patched below).
    prev = pltpu.roll(x, shift=1, axis=1)
    o_ref[...] = (x - coef * prev).astype(o_ref.dtype)

    # Column 0: the "previous" sample is either the reflect-padded x[:, 1]
    # (first T tile) or the last column of the previous T tile, read through
    # the 128-lane halo block (its final column is element t*Tt - 1).
    prev0 = jnp.where(t == 0, x[:, 1:2],
                      halo_ref[:, -1:].astype(jnp.float32))        # (Bt, 1)
    o_ref[:, 0:1] = (x[:, 0:1] - coef * prev0).astype(o_ref.dtype)


def pre_emphasis(x: jax.Array, coef: float = 0.97,
                 *, block_b: int = 256, block_t: int = 4096) -> jax.Array:
    """Equivalent of PreEmphasis.forward for a 2-D (batch, time) input."""
    assert x.ndim == 2, "The number of dimensions of input tensor must be 2!"
    assert block_b % 8 == 0 and block_t % 128 == 0
    B, T = x.shape
    assert T >= 2, "reflect padding requires at least 2 time samples"

    # Tile sizes: full dim when small, otherwise (8,128)-aligned blocks.
    Bt = B if B <= block_b else block_b
    Tt = T if T <= block_t else block_t
    nT = _cdiv(T, Tt)
    # v7x megacore: if T is a single tile, make sure the (parallel) B axis has
    # >= 2 blocks so the second TensorCore is not idle.
    if nT == 1 and Bt == B and B >= 16:
        Bt = ((B + 1) // 2 + 7) // 8 * 8
    nB = _cdiv(B, Bt)
    grid = (nB, nT)

    # Left halo block: the last 128 lanes of the previous T tile (only its
    # final column is consumed).  128 is (8,128)-legal for any T >= 128; for
    # tiny T fall back to the full dim.  Never read out of bounds: for tile t
    # it covers [t*Tt - Ht, t*Tt) which lies inside [0, T) for every t >= 1.
    Ht = 128 if T >= 128 else T
    tpb = max(Tt // Ht, 1)  # halo-sized blocks per main T tile (exact if nT>1)

    itemsize = jnp.dtype(x.dtype).itemsize
    # Live VMEM: double-buffered input + output + halo blocks (+ margin).
    live_bytes = 2 * (2 * Bt * Tt + Bt * Ht) * itemsize
    vmem_limit = min(max(int(1.5 * live_bytes) + (2 << 20), 32 << 20), 56 << 20)

    return pl.pallas_call(
        functools.partial(_preemphasis_kernel, coef=coef),
        out_shape=jax.ShapeDtypeStruct((B, T), x.dtype),
        grid_spec=pltpu.PrefetchScalarGridSpec(
            num_scalar_prefetch=0,
            grid=grid,
            in_specs=[
                pl.BlockSpec((Bt, Tt), lambda b, t: (b, t)),
                pl.BlockSpec((Bt, Ht),
                             lambda b, t: (b, jnp.maximum(t * tpb - 1, 0))),
            ],
            out_specs=pl.BlockSpec((Bt, Tt), lambda b, t: (b, t)),
        ),
        compiler_params=pltpu.CompilerParams(
            dimension_semantics=("parallel", "parallel"),
            vmem_limit_bytes=vmem_limit),
        cost_estimate=pl.CostEstimate(
            flops=2 * B * T,
            transcendentals=0,
            bytes_accessed=2 * B * T * itemsize),
    )(x, x)  # x passed twice: main tile + left-halo view of the same array


def _pre_emphasis_ref(x: jax.Array, coef: float = 0.97) -> jax.Array:
    # Pure-JAX reference mirroring F.pad(..., 'reflect') + conv1d([-coef, 1.0]).
    prev = jnp.concatenate([x[:, 1:2], x[:, :-1]], axis=1)
    return x - coef * prev


if __name__ == "__main__":
    coef = 0.97  # matches the module's registered buffer [-0.97, 1.0]
    k0, k1, k2, k3 = jax.random.split(jax.random.PRNGKey(0), 4)

    # 1) Small single-tile case (full-array block, T < 128 halo fallback).
    x = jax.random.normal(k0, (2, 16), dtype=jnp.float32)
    y = jax.block_until_ready(pre_emphasis(x, coef))
    assert y.shape == (2, 16) and y.dtype == jnp.float32
    assert jnp.allclose(y, _pre_emphasis_ref(x, coef), atol=1e-6, rtol=1e-6)

    # 2) Multi-T-tile case: exercises the halo block and the t==0 reflect gate
    #    (grid = (1, 3) with block_t=128).
    x2 = jax.random.normal(k1, (8, 384), dtype=jnp.float32)
    y2 = jax.block_until_ready(pre_emphasis(x2, coef, block_b=8, block_t=128))
    assert jnp.allclose(y2, _pre_emphasis_ref(x2, coef), atol=1e-6, rtol=1e-6)

    # 3) Ragged B and ragged last T tile (grid = (3, 4), masked stores).
    x3 = jax.random.normal(k2, (20, 400), dtype=jnp.float32)
    y3 = jax.block_until_ready(pre_emphasis(x3, coef, block_b=8, block_t=128))
    assert jnp.allclose(y3, _pre_emphasis_ref(x3, coef), atol=1e-6, rtol=1e-6)

    # 4) Single T tile with B >= 16: exercises the B-split for v7x megacore.
    x4 = jax.random.normal(k3, (16, 256), dtype=jnp.float32)
    y4 = jax.block_until_ready(pre_emphasis(x4, coef))
    assert jnp.allclose(y4, _pre_emphasis_ref(x4, coef), atol=1e-6, rtol=1e-6)

    print("KERNEL_OK")
</pallas_src>

<mosaic_0001>
module attributes {stable_mosaic.version = 11 : i64} {
  func.func @_preemphasis_kernel(%arg0: i32, %arg1: i32, %arg2: memref<2x16xf32, #tpu.memory_space<vmem>>, %arg3: memref<2x16xf32, #tpu.memory_space<vmem>>, %arg4: memref<2x16xf32, #tpu.memory_space<vmem>>) attributes {dimension_semantics = [#tpu.dimension_semantics<parallel>, #tpu.dimension_semantics<parallel>], iteration_bounds = array<i64: 1, 1>, scalar_prefetch = 0 : i64, scratch_operands = 0 : i64, tpu.core_type = #tpu.core_type<tc>, window_params = [{transform_indices = @transform_0, window_bounds = array<i64: 2, 16>}, {transform_indices = @transform_1, window_bounds = array<i64: 2, 16>}, {transform_indices = @transform_2, window_bounds = array<i64: 2, 16>}]} {
    %c0 = arith.constant 0 : index
    %c0_0 = arith.constant 0 : index
    %0 = vector.load %arg2[%c0, %c0_0] : memref<2x16xf32, #tpu.memory_space<vmem>>, vector<2x16xf32>
    %c1_i32 = arith.constant 1 : i32
    %1 = tpu.dynamic_rotate %0 by %c1_i32 dim 1 : vector<2x16xf32>, i32 -> vector<2x16xf32>
    %cst = arith.constant 9.700000e-01 : f32
    %2 = vector.broadcast %cst : f32 to vector<2x16xf32>
    %3 = arith.mulf %2, %1 : vector<2x16xf32>
    %4 = arith.subf %0, %3 : vector<2x16xf32>
    %c0_1 = arith.constant 0 : index
    %c0_2 = arith.constant 0 : index
    %5 = vector.load %arg4[%c0_1, %c0_2] : memref<2x16xf32, #tpu.memory_space<vmem>>, vector<2x16xf32>
    tpu.vector_store %arg4[%c0_1, %c0_2], %4 {strides = array<i32>} : memref<2x16xf32, #tpu.memory_space<vmem>>, vector<2x16xf32>,
    %c0_i32 = arith.constant 0 : i32
    %6 = arith.cmpi eq, %arg1, %c0_i32 : i32
    %7 = vector.extract_strided_slice %0 {offsets = [0, 1], sizes = [2, 1], strides = [1, 1]} : vector<2x16xf32> to vector<2x1xf32>
    %c0_3 = arith.constant 0 : index
    %c15 = arith.constant 15 : index
    %8 = vector.load %arg3[%c0_3, %c15] : memref<2x16xf32, #tpu.memory_space<vmem>>, vector<2x1xf32>
    %9 = arith.select %6, %7, %8 : vector<2x1xf32>
    %10 = vector.extract_strided_slice %0 {offsets = [0, 0], sizes = [2, 1], strides = [1, 1]} : vector<2x16xf32> to vector<2x1xf32>
    %cst_4 = arith.constant 9.700000e-01 : f32
    %11 = vector.broadcast %cst_4 : f32 to vector<2x1xf32>
    %12 = arith.mulf %11, %9 : vector<2x1xf32>
    %13 = arith.subf %10, %12 : vector<2x1xf32>
    %c0_5 = arith.constant 0 : index
    %c0_6 = arith.constant 0 : index
    %14 = vector.load %arg4[%c0_5, %c0_6] : memref<2x16xf32, #tpu.memory_space<vmem>>, vector<2x1xf32>
    tpu.vector_store %arg4[%c0_5, %c0_6], %13 {strides = array<i32>} : memref<2x16xf32, #tpu.memory_space<vmem>>, vector<2x1xf32>,
    return
  }
  func.func @transform_0(%arg0: i32, %arg1: i32) -> (i32, i32) {
    %c0_i32 = arith.constant 0 : i32
    return %arg0, %arg1 : i32, i32
  }
  func.func @transform_1(%arg0: i32, %arg1: i32) -> (i32, i32) {
    %c1_i32 = arith.constant 1 : i32
    %0 = arith.muli %arg1, %c1_i32 : i32
    %c1_i32_0 = arith.constant 1 : i32
    %1 = arith.subi %0, %c1_i32_0 : i32
    %c0_i32 = arith.constant 0 : i32
    %2 = arith.maxsi %1, %c0_i32 : i32
    %c0_i32_1 = arith.constant 0 : i32
    return %arg0, %2 : i32, i32
  }
  func.func @transform_2(%arg0: i32, %arg1: i32) -> (i32, i32) {
    %c0_i32 = arith.constant 0 : i32
    return %arg0, %arg1 : i32, i32
  }
}

</mosaic_0001>

<bundles_post_ra>
// kernel: tpu_custom_call.1
= control target key start
LH: loop header
LB: loop body
LE: loop exit
PB: predicated region body
PF: predicated region fallthrough
CT: control target
= control target key end

     0   :  { %7 = vsyncpa [#allocation3], 0  ;;  %s198_s0 = inlined_call_operand.hbm [shape: f32[2,16], index: 0, kind: input, shape index: {}]   ;;  %s199_s1 = inlined_call_operand.hbm [shape: f32[2,16], index: 1, kind: input, shape index: {}]   ;;  %s200_s2 = inlined_call_operand.hbm [shape: f32[2,16], index: 2, kind: output, shape index: {}]  }
   0x1   :  { %8 = vsyncpa [#allocation6], 0 }
   0x2   :  { %9 = vsyncpa [#allocation4], 0  ;;  %s168_s9 = smov [#allocation2]   ;;  %s169_s11 = smov [#allocation5]  }
   0x3   :  { %s16_s10 = sshll.u32 %s168_s9, 4  ;;  %s31_s12 = sshll.u32 %s169_s11, 4  ;;  %s17_s10 = int_to_ptr.vmem [resolvable:$true] %s16_s10  ;;  %s32_s12 = int_to_ptr.vmem [resolvable:$true] %s31_s12 }
   0x4   :  { %s110_s13 = scalar_lea.vmem %s17_s10, 32  ;;  %p115_p1 = scmp.lt.s32.totalorder %s17_s10, %s17_s10 }
   0x5   :  { %p111_p0 = scmp.ne.s32.totalorder %s17_s10, %s110_s13  ;;  %p116_p2 = scmp.lt.s32.totalorder %s110_s13, %s110_s13 }
   0x7   :  { %p117_p3 = por %p116_p2, %p115_p1 }
   0x9   :  { %p118_p4 = pnand %p117_p3, %p111_p0 }
   0xb   :  { %121 = shalt.err (!%p118_p4)
}
   0xc   :  { %19 = dma.hbm_to_vmem [thread:$0]  %s198_s0, 32, %s17_s10, [#allocation3]  }
   0xd   :  { %s130_s16 = scalar_lea.vmem %s32_s12, 32  ;;  %p135_p6 = scmp.lt.s32.totalorder %s32_s12, %s32_s12 }
   0xe   :  { %p131_p5 = scmp.ne.s32.totalorder %s32_s12, %s130_s16  ;;  %p136_p7 = scmp.lt.s32.totalorder %s130_s16, %s130_s16 }
  0x10   :  { %p137_p8 = por %p136_p7, %p135_p6 }
  0x12   :  { %p138_p9 = pnand %p137_p8, %p131_p5 }
  0x14   :  { %141 = shalt.err (!%p138_p9)
}
  0x15   :  { %34 = dma.hbm_to_vmem [thread:$0]  %s199_s1, 32, %s32_s12, [#allocation6]  }
  0x16   :  { %162 = dma.done.wait [#allocation3], 32  }
  0x17   :  { %163 = vsyncadd [#allocation3], 4294967264 }
  0x18   :  { %164 = dma.done.wait [#allocation6], 32  }
  0x19   :  { %165 = vsyncadd [#allocation6], 4294967264  ;;  %v44_v0 = vld [vmem:[#allocation2] sm:$0x3]  ;;  %s170_s19 = smov 16   ;;  %vm45_vm0 = vcmask 1047680  }
  0x1a   :  { %46 = vrot.lane.b32.xlu0 %v44_v0, %s170_s19  ;;  %s171_s0 = smov 113   ;;  %v70_v6 = vmul.f32 0.97, %v44_v0  ;;  %s172_s20 = smov 127   ;;  %vm58_vm1 = vcmask 123904   ;;  %vm76_vm2 = vcmask 1024  }
  0x1b   :  { %s173_s1 = smov [#allocation7]  }
  0x1c   :  { %s84_s21 = sshll.u32 %s173_s1, 4  ;;  %s85_s21 = int_to_ptr.vmem [resolvable:$true] %s84_s21 }
  0x1d   :  { %s142_s22 = scalar_lea.vmem %s85_s21, 32  ;;  %p147_p11 = scmp.lt.s32.totalorder %s85_s21, %s85_s21 }
  0x1e   :  { %p143_p10 = scmp.ne.s32.totalorder %s85_s21, %s142_s22  ;;  %p148_p12 = scmp.lt.s32.totalorder %s142_s22, %s142_s22 }
  0x20   :  { %p149_p13 = por %p148_p12, %p147_p11 }
  0x22   :  { %p150_p0 = pnand %p149_p13, %p143_p10 }
  0x8c   :  { %v47_v1 = vpop.permute.xlu0 %46 }
  0x8d   :  { %v48_v2 = vsel %vm45_vm0, %v47_v1, %v44_v0 }
  0x8e   :  { %49 = vrot.lane.b32.xlu0 %v48_v2, %s170_s19 }
 0x100   :  { %v50_v3 = vpop.permute.xlu0 %49 }
 0x101   :  { %v51_v4 = vsel %vm45_vm0, %v50_v3, %v44_v0 }
 0x102   :  { %v52_v5 = vmul.f32 0.97, %v51_v4 }
 0x104   :  { %54 = vrot.lane.b32.xlu1 %v52_v5, %s171_s0 }
 0x108   :  { %72 = vrot.lane.b32.xlu1 %v70_v6, %s172_s20 }
 0x176   :  { %v55_v7 = vpop.permute.xlu1 %54 }
 0x177   :  { %v57_v8 = vsub.f32 %v44_v0, %v55_v7 }
 0x179   :  { %59 = vst.msk [vmem:[#allocation7] sm:$0x3] %vm58_vm1, %v57_v8 }
 0x17a   :  { %v73_v9 = vpop.permute.xlu1 %72 }
 0x17b   :  { %v75_v10 = vsub.f32 %v44_v0, %v73_v9 }
 0x17d   :  { %77 = vst.msk [vmem:[#allocation7] sm:$0x3] %vm76_vm2, %v75_v10 }
 0x17e   :  { %153 = shalt.err (!%p150_p0)
}
 0x17f   :  { %87 = dma.vmem_to_hbm [thread:$0]  %s85_s21, 32, %s200_s2, [#allocation4]  }
 0x180   :  { %166 = dma.done.wait [#allocation4], 32  }
 0x181   :  { %167 = vsyncadd [#allocation4], 4294967264 }
 0x182   :  { %91 = vsyncpa [#allocation3], 1 }
 0x183   :  { %92 = vsyncpa [#allocation6], 1 }
 0x184   :  { %93 = vsyncpa [#allocation4], 1 }

</bundles_post_ra>
